<compile_context>
chip_gen: v7x
topology: tpu7x:2x2x1
jax: 0.10.0
libtpu: 0.0.40
codegen_flags: <defaults>
</compile_context>

<pallas_src>
import functools
import math

import jax
import jax.numpy as jnp
import numpy as np
from jax.experimental import pallas as pl
from jax.experimental.pallas import tpu as pltpu


# ---------------------------------------------------------------------------
# Stage 1: low-rank K/V projection (reduction over the KV sequence axis).
# ---------------------------------------------------------------------------
def _kv_proj_kernel(ctx_ref, wk_ref, wv_ref, effk_ref, effv_ref,
                    kp_ref, vp_ref, kacc_ref, vacc_ref):
    t = pl.program_id(1)

    @pl.when(t == 0)
    def _():
        kacc_ref[...] = jnp.zeros_like(kacc_ref)
        vacc_ref[...] = jnp.zeros_like(vacc_ref)

    cdt = ctx_ref.dtype
    ctx = ctx_ref[0]                                                  # (TKV, D)
    k = jnp.dot(ctx, wk_ref[...], preferred_element_type=jnp.float32)  # (TKV, inner)
    v = jnp.dot(ctx, wv_ref[...], preferred_element_type=jnp.float32)
    kacc_ref[...] += jnp.dot(effk_ref[...], k.astype(cdt),
                             preferred_element_type=jnp.float32)       # (K_MAX, inner)
    vacc_ref[...] += jnp.dot(effv_ref[...], v.astype(cdt),
                             preferred_element_type=jnp.float32)

    @pl.when(t == pl.num_programs(1) - 1)
    def _():
        kp_ref[0] = kacc_ref[...].astype(kp_ref.dtype)
        vp_ref[0] = vacc_ref[...].astype(vp_ref.dtype)


# ---------------------------------------------------------------------------
# Stage 2: per-(batch, query-tile) attention + output projection.
# ---------------------------------------------------------------------------
def _attn_kernel(x_ref, wq_ref, kp_ref, vp_ref, wo_ref, bo_ref, out_ref,
                 *, heads, dim_head, scale):
    cdt = x_ref.dtype
    x = x_ref[0]                                                       # (TQ, D)
    q = jnp.dot(x, wq_ref[...], preferred_element_type=jnp.float32)    # (TQ, inner)

    tq = q.shape[0]
    qh = jnp.transpose(q.astype(cdt).reshape(tq, heads, dim_head),
                       (1, 0, 2))                                      # (H, TQ, DH)
    kh = kp_ref[0]                                                     # (H, K, DH)
    vh = vp_ref[0]                                                     # (H, K, DH)

    # Head-batched scores: single dot_general with leading batch dim.
    s = jnp.einsum('hnd,hkd->hnk', qh, kh,
                   preferred_element_type=jnp.float32) * scale          # (H, TQ, K)
    s = s - jnp.max(s, axis=-1, keepdims=True)
    p = jnp.exp(s)
    p = p * pl.reciprocal(jnp.sum(p, axis=-1, keepdims=True), approx=True)
    # TODO(synk): attention dropout is identity here (inference mode); training
    # would build a mask from pltpu.prng_random_bits.

    o = jnp.einsum('hnk,hkd->hnd', p.astype(cdt), vh,
                   preferred_element_type=jnp.float32)                  # (H, TQ, DH)
    o = jnp.transpose(o, (1, 0, 2)).reshape(tq, heads * dim_head)       # (TQ, inner)

    out = jnp.dot(o.astype(cdt), wo_ref[...],
                  preferred_element_type=jnp.float32)                   # (TQ, D)
    out = out + bo_ref[...].astype(jnp.float32)
    out_ref[0] = out.astype(out_ref.dtype)


# ---------------------------------------------------------------------------
# Wrapper.
# ---------------------------------------------------------------------------
def linformer_attention(x, params, *, heads, dim_head, context=None,
                        compute_dtype=jnp.bfloat16,
                        q_tile=256, kv_tile=512, vmem_limit_bytes=None):
    """Linformer attention forward (eval mode). x: (B, N, D), context: (B, N_KV, D) or None."""
    B, N, D = x.shape
    ctx = x if context is None else context
    _, N_KV, _ = ctx.shape
    inner = heads * dim_head
    k_max = params["proj_k"].shape[1]
    scale = dim_head ** (-0.5)
    cdt = compute_dtype

    # ---- grid-invariant prep in XLA (one-time, outside the hot loop) ------
    eff_k = (params["proj_k"] * (jax.nn.sigmoid(params["gate_k"]) * params["alpha_k"])).T
    eff_v = (params["proj_v"] * (jax.nn.sigmoid(params["gate_v"]) * params["alpha_v"])).T
    w_q_t = params["w_q"].T.astype(cdt)                 # (D, inner)
    w_k_t = params["w_kv"][:inner].T.astype(cdt)        # (D, inner)
    w_v_t = params["w_kv"][inner:].T.astype(cdt)        # (D, inner)
    w_o_t = params["w_out"].T.astype(cdt)               # (inner, D)
    b_o = params["b_out"].reshape(1, D).astype(jnp.float32)
    eff_k = eff_k.astype(cdt)                           # (K_MAX, N_KV)
    eff_v = eff_v.astype(cdt)
    x_c = x.astype(cdt)
    ctx_c = ctx.astype(cdt)

    tkv = min(kv_tile, N_KV)
    tq = min(q_tile, N)
    # TODO(synk): ragged sequence lengths would need padding to the tile size.
    assert N_KV % tkv == 0 and N % tq == 0

    csize = int(np.dtype(cdt).itemsize)

    def _cparams(dims):
        kw = dict(dimension_semantics=dims)
        if vmem_limit_bytes is not None:
            kw["vmem_limit_bytes"] = int(vmem_limit_bytes)
        return pltpu.CompilerParams(**kw)

    # ---- stage 1: kp/vp = eff^T @ (ctx @ W) --------------------------------
    cost_kv = pl.CostEstimate(
        flops=int(2 * B * N_KV * D * 2 * inner + 2 * B * k_max * N_KV * 2 * inner),
        transcendentals=0,
        bytes_accessed=int(csize * (B * N_KV * D + 2 * D * inner
                                    + 2 * k_max * N_KV + 2 * B * k_max * inner)),
    )
    kp, vp = pl.pallas_call(
        _kv_proj_kernel,
        out_shape=(jax.ShapeDtypeStruct((B, k_max, inner), cdt),
                   jax.ShapeDtypeStruct((B, k_max, inner), cdt)),
        grid_spec=pltpu.PrefetchScalarGridSpec(
            num_scalar_prefetch=0,
            grid=(B, N_KV // tkv),
            in_specs=[
                pl.BlockSpec((1, tkv, D), lambda b, t: (b, t, 0)),       # ctx
                pl.BlockSpec((D, inner), lambda b, t: (0, 0)),           # Wk (pre-T)
                pl.BlockSpec((D, inner), lambda b, t: (0, 0)),           # Wv (pre-T)
                pl.BlockSpec((k_max, tkv), lambda b, t: (0, t)),         # eff_k (pre-T)
                pl.BlockSpec((k_max, tkv), lambda b, t: (0, t)),         # eff_v (pre-T)
            ],
            out_specs=[
                pl.BlockSpec((1, k_max, inner), lambda b, t: (b, 0, 0)),
                pl.BlockSpec((1, k_max, inner), lambda b, t: (b, 0, 0)),
            ],
            scratch_shapes=[pltpu.VMEM((k_max, inner), jnp.float32),
                            pltpu.VMEM((k_max, inner), jnp.float32)],
        ),
        compiler_params=_cparams(("parallel", "arbitrary")),
        cost_estimate=cost_kv,
    )(ctx_c, w_k_t, w_v_t, eff_k, eff_v)

    # Head-major rearrangement of the tiny low-rank K/V done once in XLA,
    # not per query tile inside the kernel.
    kp_h = jnp.transpose(kp.reshape(B, k_max, heads, dim_head), (0, 2, 1, 3))
    vp_h = jnp.transpose(vp.reshape(B, k_max, heads, dim_head), (0, 2, 1, 3))

    # ---- stage 2: attention + output projection ----------------------------
    cost_attn = pl.CostEstimate(
        flops=int(2 * B * N * D * inner
                  + 2 * 2 * B * heads * N * k_max * dim_head
                  + 2 * B * N * inner * D),
        transcendentals=int(B * heads * N * k_max),
        bytes_accessed=int(csize * (B * N * D + D * inner + inner * D
                                    + 2 * B * heads * k_max * dim_head)
                           + 4 * (D + B * N * D)),
    )
    kernel = functools.partial(_attn_kernel, heads=heads, dim_head=dim_head,
                               scale=scale)
    return pl.pallas_call(
        kernel,
        out_shape=jax.ShapeDtypeStruct((B, N, D), x.dtype),
        grid_spec=pltpu.PrefetchScalarGridSpec(
            num_scalar_prefetch=0,
            grid=(B, N // tq),
            in_specs=[
                pl.BlockSpec((1, tq, D), lambda b, t: (b, t, 0)),                     # x
                pl.BlockSpec((D, inner), lambda b, t: (0, 0)),                        # Wq (pre-T)
                pl.BlockSpec((1, heads, k_max, dim_head), lambda b, t: (b, 0, 0, 0)),  # kp
                pl.BlockSpec((1, heads, k_max, dim_head), lambda b, t: (b, 0, 0, 0)),  # vp
                pl.BlockSpec((inner, D), lambda b, t: (0, 0)),                        # Wo (pre-T)
                pl.BlockSpec((1, D), lambda b, t: (0, 0)),                            # bias
            ],
            out_specs=pl.BlockSpec((1, tq, D), lambda b, t: (b, t, 0)),
        ),
        compiler_params=_cparams(("parallel", "parallel")),
        cost_estimate=cost_attn,
    )(x_c, w_q_t, kp_h, vp_h, w_o_t, b_o)


# ---------------------------------------------------------------------------
# Pure-JAX reference (mirrors the PyTorch forward in eval mode).
# ---------------------------------------------------------------------------
def linformer_attention_ref(x, params, *, heads, dim_head):
    B, N, D = x.shape
    inner = heads * dim_head
    scale = dim_head ** (-0.5)
    q = x @ params["w_q"].T
    kv = x @ params["w_kv"].T
    k, v = kv[..., :inner], kv[..., inner:]
    eff_k = params["proj_k"] * (jax.nn.sigmoid(params["gate_k"]) * params["alpha_k"])
    eff_v = params["proj_v"] * (jax.nn.sigmoid(params["gate_v"]) * params["alpha_v"])
    k = jnp.einsum("bnd,nk->bkd", k, eff_k)
    v = jnp.einsum("bnd,nk->bkd", v, eff_v)
    qh = q.reshape(B, N, heads, dim_head).transpose(0, 2, 1, 3)
    kh = k.reshape(B, -1, heads, dim_head).transpose(0, 2, 1, 3)
    vh = v.reshape(B, -1, heads, dim_head).transpose(0, 2, 1, 3)
    attn = jax.nn.softmax(jnp.einsum("bhnd,bhkd->bhnk", qh, kh) * scale, axis=-1)
    out = jnp.einsum("bhnk,bhkd->bhnd", attn, vh)
    out = out.transpose(0, 2, 1, 3).reshape(B, N, inner)
    return out @ params["w_out"].T + params["b_out"]


def init_params(key, *, dim, seq_len_kv, k_max, heads, dim_head):
    inner = heads * dim_head
    ks = jax.random.split(key, 6)
    lin_scale = 1.0 / math.sqrt(dim)
    out_scale = 1.0 / math.sqrt(inner)
    return {
        "w_q": jax.random.uniform(ks[0], (inner, dim), jnp.float32,
                                  -lin_scale, lin_scale),
        "w_kv": jax.random.uniform(ks[1], (2 * inner, dim), jnp.float32,
                                   -lin_scale, lin_scale),
        "proj_k": jax.random.normal(ks[2], (seq_len_kv, k_max), jnp.float32),
        "proj_v": jax.random.normal(ks[3], (seq_len_kv, k_max), jnp.float32),
        "gate_k": jnp.full((k_max,), 0.5, jnp.float32),
        "gate_v": jnp.full((k_max,), 0.5, jnp.float32),
        "alpha_k": jnp.float32(1.0),
        "alpha_v": jnp.float32(1.0),
        "w_out": jax.random.uniform(ks[4], (dim, inner), jnp.float32,
                                    -out_scale, out_scale),
        "b_out": jax.random.uniform(ks[5], (dim,), jnp.float32,
                                    -out_scale, out_scale),
    }


if __name__ == "__main__":
    # Small shapes consistent with the module's forward.
    B, N, DIM = 2, 16, 32
    HEADS, DIM_HEAD = 4, 8
    K_MAX = 8

    key = jax.random.PRNGKey(0)
    kx, kparam = jax.random.split(key)
    x = jax.random.normal(kx, (B, N, DIM), jnp.float32)
    params = init_params(kparam, dim=DIM, seq_len_kv=N, k_max=K_MAX,
                         heads=HEADS, dim_head=DIM_HEAD)

    ref = jax.block_until_ready(
        linformer_attention_ref(x, params, heads=HEADS, dim_head=DIM_HEAD))

    # f32 MXU path: tight numerical check.
    out_f32 = jax.block_until_ready(
        linformer_attention(x, params, heads=HEADS, dim_head=DIM_HEAD,
                            compute_dtype=jnp.float32))
    np.testing.assert_allclose(np.asarray(out_f32), np.asarray(ref),
                               rtol=1e-2, atol=1e-2)

    # bf16 MXU path (default; f32 accumulation): looser check.
    out_bf16 = jax.block_until_ready(
        linformer_attention(x, params, heads=HEADS, dim_head=DIM_HEAD))
    np.testing.assert_allclose(np.asarray(out_bf16), np.asarray(ref),
                               rtol=8e-2, atol=8e-2)

    print("KERNEL_OK")
</pallas_src>

<mosaic_0001>
module attributes {stable_mosaic.version = 11 : i64} {
  func.func @_kv_proj_kernel(%arg0: i32, %arg1: i32, %arg2: memref<1x16x32xf32, #tpu.memory_space<vmem>>, %arg3: memref<32x32xf32, #tpu.memory_space<vmem>>, %arg4: memref<32x32xf32, #tpu.memory_space<vmem>>, %arg5: memref<8x16xf32, #tpu.memory_space<vmem>>, %arg6: memref<8x16xf32, #tpu.memory_space<vmem>>, %arg7: memref<1x8x32xf32, #tpu.memory_space<vmem>>, %arg8: memref<1x8x32xf32, #tpu.memory_space<vmem>>, %arg9: memref<8x32xf32, #tpu.memory_space<vmem>>, %arg10: memref<8x32xf32, #tpu.memory_space<vmem>>) attributes {dimension_semantics = [#tpu.dimension_semantics<parallel>, #tpu.dimension_semantics<arbitrary>], iteration_bounds = array<i64: 2, 1>, scalar_prefetch = 0 : i64, scratch_operands = 2 : i64, tpu.core_type = #tpu.core_type<tc>, window_params = [{transform_indices = @transform_0, window_bounds = array<i64: 1, 16, 32>}, {pipeline_mode = #tpu.pipeline_mode<synchronous>, transform_indices = @transform_1, window_bounds = array<i64: 32, 32>}, {pipeline_mode = #tpu.pipeline_mode<synchronous>, transform_indices = @transform_2, window_bounds = array<i64: 32, 32>}, {transform_indices = @transform_3, window_bounds = array<i64: 8, 16>}, {transform_indices = @transform_4, window_bounds = array<i64: 8, 16>}, {transform_indices = @transform_5, window_bounds = array<i64: 1, 8, 32>}, {transform_indices = @transform_6, window_bounds = array<i64: 1, 8, 32>}]} {
    %c0_i32 = arith.constant 0 : i32
    %0 = arith.cmpi eq, %arg1, %c0_i32 : i32
    %1 = arith.extui %0 : i1 to i32
    %c0_i32_0 = arith.constant 0 : i32
    %2 = arith.cmpi ne, %1, %c0_i32_0 : i32
    scf.if %2 {
      %cst_24 = arith.constant 0.000000e+00 : f32
      %22 = vector.broadcast %cst_24 : f32 to vector<8x32xf32>
      %c0_25 = arith.constant 0 : index
      %c0_26 = arith.constant 0 : index
      %23 = vector.load %arg9[%c0_25, %c0_26] : memref<8x32xf32, #tpu.memory_space<vmem>>, vector<8x32xf32>
      tpu.vector_store %arg9[%c0_25, %c0_26], %22 {strides = array<i32>} : memref<8x32xf32, #tpu.memory_space<vmem>>, vector<8x32xf32>,
      %cst_27 = arith.constant 0.000000e+00 : f32
      %24 = vector.broadcast %cst_27 : f32 to vector<8x32xf32>
      %c0_28 = arith.constant 0 : index
      %c0_29 = arith.constant 0 : index
      %25 = vector.load %arg10[%c0_28, %c0_29] : memref<8x32xf32, #tpu.memory_space<vmem>>, vector<8x32xf32>
      tpu.vector_store %arg10[%c0_28, %c0_29], %24 {strides = array<i32>} : memref<8x32xf32, #tpu.memory_space<vmem>>, vector<8x32xf32>,
    } else {
    }
    %c0 = arith.constant 0 : index
    %c0_1 = arith.constant 0 : index
    %c0_2 = arith.constant 0 : index
    %3 = vector.load %arg2[%c0, %c0_1, %c0_2] : memref<1x16x32xf32, #tpu.memory_space<vmem>>, vector<1x16x32xf32>
    %4 = vector.shape_cast %3 : vector<1x16x32xf32> to vector<16x32xf32>
    %c0_3 = arith.constant 0 : index
    %c0_4 = arith.constant 0 : index
    %5 = vector.load %arg3[%c0_3, %c0_4] : memref<32x32xf32, #tpu.memory_space<vmem>>, vector<32x32xf32>
    %cst = arith.constant dense<0.000000e+00> : vector<16x32xf32>
    %6 = tpu.matmul %4, %5, %cst {dimension_numbers = #tpu.dot_dimension_numbers<[1], [0], [0], [1], [0, 0, 1, 1], [], []>} : vector<16x32xf32>, vector<32x32xf32>, vector<16x32xf32> -> vector<16x32xf32>
    %c0_5 = arith.constant 0 : index
    %c0_6 = arith.constant 0 : index
    %7 = vector.load %arg4[%c0_5, %c0_6] : memref<32x32xf32, #tpu.memory_space<vmem>>, vector<32x32xf32>
    %cst_7 = arith.constant dense<0.000000e+00> : vector<16x32xf32>
    %8 = tpu.matmul %4, %7, %cst_7 {dimension_numbers = #tpu.dot_dimension_numbers<[1], [0], [0], [1], [0, 0, 1, 1], [], []>} : vector<16x32xf32>, vector<32x32xf32>, vector<16x32xf32> -> vector<16x32xf32>
    %c0_8 = arith.constant 0 : index
    %c0_9 = arith.constant 0 : index
    %9 = vector.load %arg9[%c0_8, %c0_9] : memref<8x32xf32, #tpu.memory_space<vmem>>, vector<8x32xf32>
    %c0_10 = arith.constant 0 : index
    %c0_11 = arith.constant 0 : index
    %10 = vector.load %arg5[%c0_10, %c0_11] : memref<8x16xf32, #tpu.memory_space<vmem>>, vector<8x16xf32>
    %cst_12 = arith.constant dense<0.000000e+00> : vector<8x32xf32>
    %11 = tpu.matmul %10, %6, %cst_12 {dimension_numbers = #tpu.dot_dimension_numbers<[1], [0], [0], [1], [0, 0, 1, 1], [], []>} : vector<8x16xf32>, vector<16x32xf32>, vector<8x32xf32> -> vector<8x32xf32>
    %12 = arith.addf %9, %11 : vector<8x32xf32>
    %c0_13 = arith.constant 0 : index
    %c0_14 = arith.constant 0 : index
    %13 = vector.load %arg9[%c0_13, %c0_14] : memref<8x32xf32, #tpu.memory_space<vmem>>, vector<8x32xf32>
    tpu.vector_store %arg9[%c0_13, %c0_14], %12 {strides = array<i32>} : memref<8x32xf32, #tpu.memory_space<vmem>>, vector<8x32xf32>,
    %c0_15 = arith.constant 0 : index
    %c0_16 = arith.constant 0 : index
    %14 = vector.load %arg10[%c0_15, %c0_16] : memref<8x32xf32, #tpu.memory_space<vmem>>, vector<8x32xf32>
    %c0_17 = arith.constant 0 : index
    %c0_18 = arith.constant 0 : index
    %15 = vector.load %arg6[%c0_17, %c0_18] : memref<8x16xf32, #tpu.memory_space<vmem>>, vector<8x16xf32>
    %cst_19 = arith.constant dense<0.000000e+00> : vector<8x32xf32>
    %16 = tpu.matmul %15, %8, %cst_19 {dimension_numbers = #tpu.dot_dimension_numbers<[1], [0], [0], [1], [0, 0, 1, 1], [], []>} : vector<8x16xf32>, vector<16x32xf32>, vector<8x32xf32> -> vector<8x32xf32>
    %17 = arith.addf %14, %16 : vector<8x32xf32>
    %c0_20 = arith.constant 0 : index
    %c0_21 = arith.constant 0 : index
    %18 = vector.load %arg10[%c0_20, %c0_21] : memref<8x32xf32, #tpu.memory_space<vmem>>, vector<8x32xf32>
    tpu.vector_store %arg10[%c0_20, %c0_21], %17 {strides = array<i32>} : memref<8x32xf32, #tpu.memory_space<vmem>>, vector<8x32xf32>,
    %c0_i32_22 = arith.constant 0 : i32
    %19 = arith.cmpi eq, %arg1, %c0_i32_22 : i32
    %20 = arith.extui %19 : i1 to i32
    %c0_i32_23 = arith.constant 0 : i32
    %21 = arith.cmpi ne, %20, %c0_i32_23 : i32
    scf.if %21 {
      %c0_24 = arith.constant 0 : index
      %c0_25 = arith.constant 0 : index
      %22 = vector.load %arg9[%c0_24, %c0_25] : memref<8x32xf32, #tpu.memory_space<vmem>>, vector<8x32xf32>
      %c0_26 = arith.constant 0 : index
      %c0_27 = arith.constant 0 : index
      %c0_28 = arith.constant 0 : index
      %23 = vector.load %arg7[%c0_26, %c0_27, %c0_28] : memref<1x8x32xf32, #tpu.memory_space<vmem>>, vector<1x8x32xf32>
      %24 = vector.shape_cast %23 : vector<1x8x32xf32> to vector<8x32xf32>
      %25 = vector.shape_cast %22 : vector<8x32xf32> to vector<1x8x32xf32>
      tpu.vector_store %arg7[%c0_26, %c0_27, %c0_28], %25 {strides = array<i32>} : memref<1x8x32xf32, #tpu.memory_space<vmem>>, vector<1x8x32xf32>,
      %c0_29 = arith.constant 0 : index
      %c0_30 = arith.constant 0 : index
      %26 = vector.load %arg10[%c0_29, %c0_30] : memref<8x32xf32, #tpu.memory_space<vmem>>, vector<8x32xf32>
      %c0_31 = arith.constant 0 : index
      %c0_32 = arith.constant 0 : index
      %c0_33 = arith.constant 0 : index
      %27 = vector.load %arg8[%c0_31, %c0_32, %c0_33] : memref<1x8x32xf32, #tpu.memory_space<vmem>>, vector<1x8x32xf32>
      %28 = vector.shape_cast %27 : vector<1x8x32xf32> to vector<8x32xf32>
      %29 = vector.shape_cast %26 : vector<8x32xf32> to vector<1x8x32xf32>
      tpu.vector_store %arg8[%c0_31, %c0_32, %c0_33], %29 {strides = array<i32>} : memref<1x8x32xf32, #tpu.memory_space<vmem>>, vector<1x8x32xf32>,
    } else {
    }
    return
  }
  func.func @transform_0(%arg0: i32, %arg1: i32) -> (i32, i32, i32) {
    %c0_i32 = arith.constant 0 : i32
    %c0_i32_0 = arith.constant 0 : i32
    return %arg0, %arg1, %c0_i32 : i32, i32, i32
  }
  func.func @transform_1(%arg0: i32, %arg1: i32) -> (i32, i32) {
    %c0_i32 = arith.constant 0 : i32
    %c0_i32_0 = arith.constant 0 : i32
    %c0_i32_1 = arith.constant 0 : i32
    return %c0_i32, %c0_i32_0 : i32, i32
  }
  func.func @transform_2(%arg0: i32, %arg1: i32) -> (i32, i32) {
    %c0_i32 = arith.constant 0 : i32
    %c0_i32_0 = arith.constant 0 : i32
    %c0_i32_1 = arith.constant 0 : i32
    return %c0_i32, %c0_i32_0 : i32, i32
  }
  func.func @transform_3(%arg0: i32, %arg1: i32) -> (i32, i32) {
    %c0_i32 = arith.constant 0 : i32
    %c0_i32_0 = arith.constant 0 : i32
    return %c0_i32, %arg1 : i32, i32
  }
  func.func @transform_4(%arg0: i32, %arg1: i32) -> (i32, i32) {
    %c0_i32 = arith.constant 0 : i32
    %c0_i32_0 = arith.constant 0 : i32
    return %c0_i32, %arg1 : i32, i32
  }
  func.func @transform_5(%arg0: i32, %arg1: i32) -> (i32, i32, i32) {
    %c0_i32 = arith.constant 0 : i32
    %c0_i32_0 = arith.constant 0 : i32
    %c0_i32_1 = arith.constant 0 : i32
    return %arg0, %c0_i32, %c0_i32_0 : i32, i32, i32
  }
  func.func @transform_6(%arg0: i32, %arg1: i32) -> (i32, i32, i32) {
    %c0_i32 = arith.constant 0 : i32
    %c0_i32_0 = arith.constant 0 : i32
    %c0_i32_1 = arith.constant 0 : i32
    return %arg0, %c0_i32, %c0_i32_0 : i32, i32, i32
  }
}

</mosaic_0001>

<bundles_post_ra>
// kernel: tpu_custom_call.1
= control target key start
LH: loop header
LB: loop body
LE: loop exit
PB: predicated region body
PF: predicated region fallthrough
CT: control target
= control target key end

     0   :  { %s1719_s0 = inlined_call_operand.hbm [shape: f32[2,16,32], index: 0, kind: input, shape index: {}]   ;;  %s1720_s1 = inlined_call_operand.hbm [shape: f32[32,32], index: 1, kind: input, shape index: {}]   ;;  %s1721_s2 = inlined_call_operand.hbm [shape: f32[32,32], index: 2, kind: input, shape index: {}]   ;;  %s1722_s3 = inlined_call_operand.vmem [shape: f32[8,16], index: 3, kind: input, shape index: {}]   ;;  %s1723_s4 = inlined_call_operand.hbm [shape: f32[8,16], index: 4, kind: input, shape index: {}]   ;;  %s1724_s5 = inlined_call_operand.hbm [shape: f32[2,8,32], index: 5, kind: output, shape index: {0}]   ;;  %s1725_s6 = inlined_call_operand.hbm [shape: f32[2,8,32], index: 6, kind: output, shape index: {1}]  }
   0x1   :  { %1733 = sst [smem:[#allocation22_spill]] %s1725_s6 }
   0x2   :  { %12 = vsyncpa [#allocation5], 0 }
   0x3   :  { %14 = vsyncpa [#allocation5 + $0x1], 0 }
   0x4   :  { %15 = vsyncpa [#allocation8], 0 }
   0x5   :  { %16 = vsyncpa [#allocation11], 0 }
   0x6   :  { %17 = vsyncpa [#allocation6], 0 }
   0x7   :  { %19 = vsyncpa [#allocation6 + $0x1], 0 }
   0x8   :  { %20 = vsyncpa [#allocation14], 0 }
   0x9   :  { %22 = vsyncpa [#allocation14 + $0x1], 0  ;;  %s1385_s21 = smov 0   ;;  %s1387_s22 = smov 0  }
   0xa   :  { %s1389_s23 = smov 0   ;;  %s1391_s24 = smov 0  }
   0xb   :  { %s1393_s25 = smov 0   ;;  %s1395_s26 = smov 0  }
   0xc LB: > { %1734 = sst [smem:[#allocation20_spill]] %s1317_s21  ;;  %s891_s27 = sadd.s32 4294967295, %s1337_s26   ;;  %s1337_s26 = sphi %s1395_s26, %s28_s26   ;;  %s1333_s25 = sphi %s1393_s25, %s1760_s25   ;;  %s1329_s24 = sphi %s1391_s24, %s1759_s24   ;;  %s1325_s23 = sphi %s1389_s23, %s1758_s23   ;;  %s1321_s22 = sphi %s1387_s22, %s1757_s22   ;;  %s1317_s21 = sphi %s1385_s21, %s1756_s21  }
   0xd   : > { %s892_s28 = sadd.s32 4294967294, %s1337_s26   ;;  %p62_p0 = scmp.ne.s32.totalorder %s1321_s22, %s1317_s21 }
   0xe   : > { %p1419_p1 = scmp.eq.s32.totalorder %s891_s27, 0  ;;  %p1423_p2 = scmp.eq.s32.totalorder %s891_s27, 1 }
   0xf   : > { %p186_p3 = scmp.eq.s32.totalorder %s892_s28, 1  ;;  %p893_p5 = scmp.ge.s32.totalorder %s1337_s26, 1 }
  0x10   : > { %s1735_s29 = scalar_select %p1419_p1, 1, 0 }
  0x11   : > { %s1736_s30 = scalar_select %p1423_p2, 1, 0 }
  0x12   : > { %p1429_p4 = por %p1419_p1, %p62_p0  ;;  %p1434_p6 = por %p186_p3, %p62_p0 }
  0x13   : > { %p219_p7 = scmp.lt.s32.totalorder %s1337_s26, 3  ;;  %s1339_s10 = smov [#allocation7]  }
  0x14   : > { %s1737_s7 = scalar_select %p1429_p4, 1, 0 }
  0x15   : > { %s1738_s8 = scalar_select %p1434_p6, 1, 0 }
  0x16   : > { %p1439_p8 = pnand %p893_p5, %p219_p7  ;;  %s231_s11 = sshll.u32 %s1339_s10, 4  ;;  %s1443_s11 = int_to_ptr.vmem [resolvable:$true] %s231_s11 }
  0x17   : > { %1739 = sst [smem:[#allocation21_spill]] %s1738_s8  ;;  %s1340_s13 = smov [#allocation9]  }
  0x18   : > { %s1740_s9 = scalar_select %p1439_p8, 1, 0 }
  0x19   : > { %p1016_p9 = pneg %p1439_p8  ;;  %s244_s14 = sshll.u32 %s1340_s13, 4  ;;  %s1454_s14 = int_to_ptr.vmem [resolvable:$true] %s244_s14 }
  0x1a   : > { %s1341_s15 = smov [#allocation10]   ;;  %s1101_s19 = scalar_lea.hbm %s1720_s1, 512 }
  0x1b   : > { %p1450_p11 = pnand %p1016_p9, %p1419_p1  ;;  %s1456_s16 = sshll.u32 %s1341_s15, 4  ;;  %s268_s16 = int_to_ptr.vmem [resolvable:$true] %s1456_s16 }
  0x1c   : > { %p1102_p12 = scmp.ne.s32.totalorder %s1720_s1, %s1101_s19  ;;  %p1108_p5 = scmp.lt.u32.totalorder %s1101_s19, %s1720_s1 }
  0x1d   : > { %p1466_p13 = pneg %p1450_p11 }
  0x1f   : > { %p1104_p0 = pnand %p1466_p13, %p1102_p12 }
  0x21   : > { %p1105_p3 = pneg %p1104_p0 }
  0x23   : > { %p1110_p7 = pnand %p1108_p5, %p1105_p3 }
  0x25   : > { %1113 = shalt.err (!%p1110_p7)
}
  0x26   : > { %s1114_s15 = scalar_lea.vmem %s1443_s11, 512  ;;  %p1122_p1 = scmp.lt.s32.totalorder %s1443_s11, %s1443_s11 }
  0x27   : > { %p1115_p9 = scmp.ne.s32.totalorder %s1443_s11, %s1114_s15  ;;  %p1123_p4 = scmp.lt.s32.totalorder %s1114_s15, %s1114_s15 }
  0x29   : > { %p1117_p10 = pnand %p1115_p9, %p1466_p13  ;;  %p1124_p12 = por %p1123_p4, %p1122_p1 }
  0x2b   : > { %p1118_p6 = pneg %p1117_p10 }
  0x2d   : > { %p1125_p0 = pnand %p1124_p12, %p1118_p6 }
  0x2f   : > { %1128 = shalt.err (!%p1125_p0)
}
  0x30   : > { %s1342_s17 = smov 128   ;;  %s1343_s18 = smov 8  }
  0x31   : > { %1019 = dma.hbm_to_vmem [thread:$0]  (!%p1450_p11), %s1720_s1, 512, %s1443_s11, [#allocation8], %s1342_s17, %s1342_s17, %s1343_s18  }
  0x32   : > { %s1129_s13 = scalar_lea.hbm %s1721_s2, 512 }
  0x33   : > { %p1130_p1 = scmp.ne.s32.totalorder %s1721_s2, %s1129_s13  ;;  %p1136_p10 = scmp.lt.u32.totalorder %s1129_s13, %s1721_s2 }
  0x35   : > { %p1132_p4 = pnand %p1130_p1, %p1466_p13 }
  0x37   : > { %p1133_p6 = pneg %p1132_p4 }
  0x39   : > { %p1138_p3 = pnand %p1136_p10, %p1133_p6 }
  0x3b   : > { %1141 = shalt.err (!%p1138_p3)
}
  0x3c   : > { %s1142_s11 = scalar_lea.vmem %s1454_s14, 512  ;;  %p1150_p12 = scmp.lt.s32.totalorder %s1454_s14, %s1454_s14 }
  0x3d   : > { %p1143_p5 = scmp.ne.s32.totalorder %s1454_s14, %s1142_s11  ;;  %p1151_p0 = scmp.lt.s32.totalorder %s1142_s11, %s1142_s11 }
  0x3f   : > { %p1145_p7 = pnand %p1143_p5, %p1466_p13  ;;  %p1152_p1 = por %p1151_p0, %p1150_p12 }
  0x41   : > { %p1146_p9 = pneg %p1145_p7 }
  0x43   : > { %p1153_p4 = pnand %p1152_p1, %p1146_p9 }
  0x45   : > { %1156 = shalt.err (!%p1153_p4)
}
  0x46   : > { %1022 = dma.hbm_to_vmem [thread:$0]  (!%p1450_p11), %s1721_s2, 512, %s1454_s14, [#allocation8], %s1342_s17, %s1342_s17, %s1343_s18  }
  0x47   : > { %s1157_s20 = scalar_lea.hbm %s1723_s4, 128 }
  0x48   : > { %p1158_p6 = scmp.ne.s32.totalorder %s1723_s4, %s1157_s20  ;;  %p1164_p5 = scmp.lt.u32.totalorder %s1157_s20, %s1723_s4 }
  0x4a   : > { %p1160_p10 = pnand %p1158_p6, %p1466_p13 }
  0x4c   : > { %p1161_p3 = pneg %p1160_p10 }
  0x4e   : > { %p1166_p7 = pnand %p1164_p5, %p1161_p3 }
  0x50   : > { %1169 = shalt.err (!%p1166_p7)
}
  0x51   : > { %s1170_s11 = scalar_lea.vmem %s268_s16, 128  ;;  %p1178_p1 = scmp.lt.s32.totalorder %s268_s16, %s268_s16 }
  0x52   : > { %p1171_p9 = scmp.ne.s32.totalorder %s268_s16, %s1170_s11  ;;  %p1179_p4 = scmp.lt.s32.totalorder %s1170_s11, %s1170_s11 }
  0x54   : > { %p1173_p12 = pnand %p1171_p9, %p1466_p13  ;;  %p1180_p8 = por %p1179_p4, %p1178_p1 }
  0x56   : > { %p1174_p0 = pneg %p1173_p12 }
  0x58   : > { %p1181_p2 = pnand %p1180_p8, %p1174_p0 }
  0x5a   : > { %1184 = shalt.err (!%p1181_p2)
}
  0x5b   : > { %1025 = dma.hbm_to_vmem [thread:$0]  (!%p1450_p11), %s1723_s4, 128, %s268_s16, [#allocation11]  }
  0x5c   : > { %s49_s28 = sadd.s32 1, %s1325_s23  ;;  %s40_s21 = sadd.s32 1, %s1333_s25 }
  0x5d   : > { %p56_p2 = scmp.ne.s32.totalorder %s1325_s23, %s1321_s22  ;;  %p42_p8 = scmp.ge.s32.totalorder %s40_s21, 2 }
  0x5e   : > { %p57_p13 = scmp.eq.s32.totalorder %s1337_s26, 0  ;;  %p1743_p6 = scmp.ne.s32.totalorder %s1736_s30, 0 }
  0x5f   : > { %p1040_p3 = scmp.lt.s32.totalorder %s1337_s26, 2  ;;  %s1762_s21 = smov (%p42_p8, %s40_s21), 0 }
  0x60   : > { %p1542_p10 = por %p1743_p6, %p56_p2  ;;  %p58_p5 = por %p57_p13, %p56_p2 }
  0x61   : > { %s278_s8 = sand.u32 1, %s1325_s23   ;;  %s44_s19 = ssub.s32 %s1333_s25, %s1762_s21 }
  0x62   : > { %p47_p7 = scmp.eq.s32.totalorder %s44_s19, 0  ;;  %s899_s16 = sshll.u32 %s278_s8, 4 }
  0x63   : > { %s921_s20 = sshll.u32 %s1333_s25, 8  ;;  %s282_s15 = scalar_lea.vmem [#allocation4], %s899_s16 }
  0x64   : > { %s1554_s27 = scalar_select %p47_p7, %s1325_s23, %s49_s28  }
  0x65   : > { %s1559_s30 = scalar_lea.hbm %s1719_s0, %s921_s20  ;;  %s291_s11 = sshll.u32 %s282_s15, 4  ;;  %s1561_s11 = int_to_ptr.vmem [resolvable:$true] %s291_s11 }
  0x66   : > { %p1565_p11 = pnand %p1040_p3, %p58_p5  ;;  %s1569_s6 = scalar_lea.sflag [#allocation5], %s278_s8 }
  0x67   : > { %s1185_s28 = scalar_lea.hbm %s1559_s30, 256  ;;  %s1190_s20 = scalar_lea.hbm %s1719_s0, 512 }
  0x68   : > { %p1186_p9 = scmp.ne.s32.totalorder %s1559_s30, %s1185_s28  ;;  %p1187_p12 = pneg %p1565_p11 }
  0x69   : > { %p1191_p4 = scmp.lt.u32.totalorder %s1559_s30, %s1719_s0  ;;  %p1192_p2 = scmp.lt.u32.totalorder %s1190_s20, %s1185_s28 }
  0x6a   : > { %p1188_p0 = pnand %p1187_p12, %p1186_p9  ;;  %p1194_p13 = scmp.lt.u32.totalorder %s1185_s28, %s1559_s30 }
  0x6b   : > { %p1193_p8 = por %p1192_p2, %p1191_p4 }
  0x6c   : > { %p1189_p1 = pneg %p1188_p0 }
  0x6d   : > { %p1195_p6 = por %p1194_p13, %p1193_p8 }
  0x6f   : > { %p1196_p3 = pnand %p1195_p6, %p1189_p1 }
  0x71   : > { %1199 = shalt.err (!%p1196_p3)
}
  0x72   : > { %s1200_s8 = scalar_lea.vmem %s1561_s11, 256  ;;  %s1344_s15 = smov [#allocation4]  }
  0x73   : > { %p1201_p5 = scmp.ne.s32.totalorder %s1561_s11, %s1200_s8  ;;  %s1205_s19 = sshll.u32 %s1344_s15, 4  ;;  %s1206_s19 = int_to_ptr.vmem [resolvable:$false] %s1205_s19 }
  0x74   : > { %s1207_s16 = scalar_lea.vmem %s1206_s19, 512  ;;  %p1208_p0 = scmp.lt.s32.totalorder %s1561_s11, %s1206_s19 }
  0x75   : > { %p1203_p7 = pnand %p1201_p5, %p1187_p12  ;;  %p1209_p4 = scmp.lt.s32.totalorder %s1207_s16, %s1200_s8 }
  0x77   : > { %p1204_p9 = pneg %p1203_p7  ;;  %p1210_p2 = por %p1209_p4, %p1208_p0 }
  0x79   : > { %p1211_p8 = pnand %p1210_p2, %p1204_p9 }
  0x7b   : > { %1214 = shalt.err (!%p1211_p8)
}
  0x7c   : > { %1029 = dma.hbm_to_vmem [thread:$0]  (!%p1565_p11), %s1559_s30, 256, %s1561_s11, %s1569_s6, %s1342_s17, %s1342_s17, %s1343_s18  }
  0x7d   : > { %p1746_p12 = scmp.ne.s32.totalorder %s1740_s9, 0 }
  0x7e   : > { %s1603_s28 = sand.u32 (!%p1746_p12), 1, %s1321_s22   ;;  %p1747_p1 = scmp.ne.s32.totalorder (!%p1746_p12), %s1737_s7, 0 }
  0x7f   : > { %303 = sbr.rel (%p1746_p12) target bundleno = 629 (0x275), region = 40  ;;  %s903_s20 = sshll.u32 (!%p1746_p12), %s1603_s28, 4 }
  0x80   : > { %s306_s10 = scalar_lea.sflag (!%p1746_p12), [#allocation5], %s1603_s28  ;;  %s309_s13 = scalar_lea.vmem (!%p1746_p12), [#allocation4], %s903_s20 }
  0x86   : > { %1296 = dma.done.wait (%p1747_p1), %s306_s10, 256  }
  0x87   : > { %1298 = vsyncadd (%p1747_p1), %s306_s10, 4294967040  ;;  %p1748_p13 = scmp.ne.s32.totalorder %s1735_s29, 0 }
  0x89   : > { %1300 = dma.done.wait (%p1748_p13), [#allocation8], 1024  }
  0x8a   : > { %1302 = vsyncadd (%p1748_p13), [#allocation8], 4294966272 }
  0x8b   : > { %1304 = dma.done.wait (%p1748_p13), [#allocation11], 128  }
  0x8c   : > { %1306 = vsyncadd (%p1748_p13), [#allocation11], 4294967168  ;;  %v373_v0 = vld [vmem:[#allocation7] sm:$0xff]  ;;  %v374_v1 = vld [vmem:[#allocation7 + $0x8] sm:$0xff]  ;;  %vm368_vm0 = vcmask 261120   ;;  %v1345_v14 = vmov 0.0|0.0  }
  0x8d   : > { %v459_v2 = vld [vmem:[#allocation9] sm:$0xff]  ;;  %v976_v3 = vpack.c.bf16 %v374_v1, %v373_v0  ;;  %v460_v4 = vld [vmem:[#allocation9 + $0x8] sm:$0xff]  ;;  %v375_v5 = vld [vmem:[#allocation7 + $0x10] sm:$0xff]  ;;  %v1346_v15 = vmov 0.0   ;;  %vm1347_vm1 = vmmov 0   ;;  %vm540_vm2 = vcmask 130048  }
  0x8e   : > { %v376_v6 = vld [vmem:[#allocation7 + $0x18] sm:$0xff]  ;;  %v984_v7 = vpack.c.bf16 %v460_v4, %v459_v2  ;;  %v461_v9 = vld [vmem:[#allocation9 + $0x10] sm:$0xff]  ;;  %369 = vst.msk [vmem:[#allocation2] sm:$0xff] %vm368_vm0, %v1346_v15  ;;  %370 = vst.msk [vmem:[#allocation3] sm:$0xff] %vm368_vm0, %v1346_v15  ;;  %s907_s9 = sshll.u32 %s1603_s28, 3  ;;  %s917_s17 = sshll.u32 %s1329_s24, 7 }
  0x8f   : > { %v980_v8 = vpack.c.bf16 %v376_v6, %v375_v5  ;;  %v462_v10 = vld [vmem:[#allocation9 + $0x18] sm:$0xff]  ;;  %v371_v11 = vld [vmem:[%s309_s13] sm:$0xff]  ;;  %977 = vmatprep.subr.bf16.mxu0 %v976_v3  ;;  %s351_s18 = scalar_lea.vmem [#allocation12], %s907_s9  ;;  %s1632_s11 = scalar_lea.vmem [#allocation13], %s907_s9 }
  0x90   : > { %v988_v12 = vpack.c.bf16 %v462_v10, %v461_v9  ;;  %948 = vmatprep.mubr.msk.f32.mxu0 %vm368_vm0, %v371_v11  ;;  %985 = vmatprep.subr.bf16.mxu1 %v984_v7  ;;  %v372_v13 = vld [vmem:[%s309_s13 + $0x8] sm:$0xff]  ;;  %v539_v22 = vld [vmem:[%s1722_s3] sm:$0xff]  ;;  %v617_v23 = vld [vmem:[#allocation10] sm:$0xff]  ;;  %s719_s30 = sshll.u32 %s351_s18, 4  ;;  %s732_s14 = sshll.u32 %s1632_s11, 4  ;;  %s1640_s30 = int_to_ptr.vmem [resolvable:$true] %s719_s30  ;;  %s1647_s14 = int_to_ptr.vmem [resolvable:$true] %s732_s14 }
  0x91   : > { %979 = vmatpush3.bf16.msra.mxu0 %v976_v3  ;;  %987 = vmatpush3.bf16.msra.mxu1 %v984_v7  ;;  %s1638_s15 = scalar_lea.hbm %s1724_s5, %s917_s17  ;;  %s1749_s24 = sld [smem:[#allocation22_spill]] }
  0x92   : > { %981 = vmatprep.subr.bf16.mxu0 %v980_v8  ;;  %989 = vmatprep.subr.bf16.mxu1 %v988_v12  ;;  %s701_s13 = scalar_lea.sflag [#allocation6], %s1603_s28  ;;  %s1215_s29 = scalar_lea.vmem %s1640_s30, 128 }
  0x93   : > { %959 = vmatprep.mubr.msk.f32.mxu1 %vm368_vm0, %v371_v11  ;;  %p1216_p11 = scmp.ne.s32.totalorder %s1640_s30, %s1215_s29  ;;  %s1348_s7 = smov [#allocation12]  }
  0x94   : > { %s1219_s9 = sshll.u32 %s1348_s7, 4  ;;  %s1220_s9 = int_to_ptr.vmem [resolvable:$false] %s1219_s9 }
  0x95   : > { %983 = vmatpush3.bf16.msra.mxu0 %v980_v8  ;;  %991 = vmatpush3.bf16.msra.mxu1 %v988_v12  ;;  %v538_v24 = vld [vmem:[#allocation2] sm:$0xff]  ;;  %v616_v25 = vld [vmem:[#allocation3] sm:$0xff]  ;;  %p1217_p6 = pnand %p1216_p11, %p1542_p10  ;;  %s1221_s6 = scalar_lea.vmem %s1220_s9, 256 }
  0x96   : > { %992 = vmatprep.subr.bf16.mxu0 %v1345_v14  ;;  %995 = vmatprep.subr.bf16.mxu1 %v1345_v14  ;;  %p1222_p5 = scmp.lt.s32.totalorder %s1640_s30, %s1220_s9  ;;  %p1223_p7 = scmp.lt.s32.totalorder %s1221_s6, %s1215_s29 }
  0x97   : > { %s1750_s20 = smov %s1749_s24  ;;  %s1645_s10 = scalar_lea.hbm %s1749_s24, %s917_s17 }
  0x98   : > { %949 = vmatmul.mubr.msk.f32.vlgmr.msra.gmra.mrb[0].mxu0 %vm368_vm0, %v372_v13  ;;  %960 = vmatmul.mubr.msk.f32.vlgmr.msra.gmra.mrb[0].mxu1 %vm368_vm0, %v372_v13  ;;  %p1218_p3 = pneg %p1217_p6  ;;  %p1224_p9 = por %p1223_p7, %p1222_p5 }
  0x99   : > { %966 = vmatprep.mubr.msk.f32.mxu0 %vm1347_vm1, %v1346_v15  ;;  %973 = vmatprep.mubr.msk.f32.mxu1 %vm1347_vm1, %v1346_v15 }
  0x9a   : > { %p1225_p0 = pnand %p1224_p9, %p1218_p3 }
 0x16b   : > { %v950_v16 = vpop.f32.mrb[0].mxu0  ;;  %v961_v17 = vpop.f32.mrb[0].mxu1 }
 0x16c   : > { %v450_v18 = vpop.f32.mrb[1].mxu0  ;;  %v529_v20 = vpop.f32.mrb[1].mxu1 }
 0x16d   : > { %v993_v19 = vpack.c.bf16 %v950_v16, %v450_v18  ;;  %v996_v21 = vpack.c.bf16 %v961_v17, %v529_v20 }
 0x16f   : > { %994 = vmatpush3.bf16.msra.mxu0 %v993_v19  ;;  %997 = vmatpush3.bf16.msra.mxu1 %v996_v21 }
 0x172   : > { %967 = vmatmul.mubr.msk.f32.vlgmr.msra.gmra.mrb[2].mxu0 %vm540_vm2, %v539_v22  ;;  %974 = vmatmul.mubr.msk.f32.vlgmr.msra.gmra.mrb[2].mxu1 %vm540_vm2, %v617_v23 }
 0x245   : > { %v610_v26 = vpop.f32.mrb[2].mxu0  ;;  %v687_v28 = vpop.f32.mrb[2].mxu1 }
 0x246   : > { %v614_v27 = vadd.f32 %v610_v26, %v538_v24  ;;  %v968_v29 = vpop.f32.mrb[3].mxu0  ;;  %v691_v30 = vadd.f32 %v687_v28, %v616_v25  ;;  %v975_v31 = vpop.f32.mrb[3].mxu1 }
 0x248   : > { %615 = vst.msk [vmem:[#allocation2] sm:$0xff] %vm368_vm0, %v614_v27  ;;  %692 = vst.msk [vmem:[#allocation3] sm:$0xff] %vm368_vm0, %v691_v30 }
 0x24f   : > { %v696_v32 = vld [vmem:[#allocation2] sm:$0xff]  ;;  %v698_v33 = vld [vmem:[#allocation3] sm:$0xff] }
 0x250   : > { %697 = vst.msk [vmem:[%s351_s18] sm:$0xff] %vm368_vm0, %v696_v32 }
 0x251   : > { %1228 = shalt.err (!%p1225_p0)
}
 0x252   : > { %s1229_s17 = scalar_lea.hbm %s1638_s15, 128  ;;  %s1233_s19 = scalar_lea.hbm %s1724_s5, 256 }
 0x253   : > { %p1230_p4 = scmp.ne.s32.totalorder %s1638_s15, %s1229_s17  ;;  %p1234_p12 = scmp.lt.u32.totalorder %s1638_s15, %s1724_s5 }
 0x254   : > { %p1235_p1 = scmp.lt.u32.totalorder %s1233_s19, %s1229_s17  ;;  %p1237_p11 = scmp.lt.u32.totalorder %s1229_s17, %s1638_s15 }
 0x255   : > { %p1231_p2 = pnand %p1230_p4, %p1542_p10 }
 0x256   : > { %p1236_p13 = por %p1235_p1, %p1234_p12 }
 0x257   : > { %p1232_p8 = pneg %p1231_p2 }
 0x258   : > { %p1238_p6 = por %p1237_p11, %p1236_p13 }
 0x25a   : > { %p1239_p3 = pnand %p1238_p6, %p1232_p8 }
 0x25c   : > { %1242 = shalt.err (!%p1239_p3)
}
 0x25d   : > { %1012 = dma.vmem_to_hbm [thread:$0]  (%p1542_p10), %s1640_s30, 128, %s1638_s15, %s701_s13   ;;  %699 = vst.msk [vmem:[%s1632_s11] sm:$0xff] %vm368_vm0, %v698_v33 }
 0x25e   : > { %s706_s29 = scalar_lea.sflag [#allocation14], %s1603_s28  ;;  %s1243_s7 = scalar_lea.vmem %s1647_s14, 128 }
 0x25f   : > { %p1244_p5 = scmp.ne.s32.totalorder %s1647_s14, %s1243_s7  ;;  %s1349_s9 = smov [#allocation13]  }
 0x260   : > { %s1247_s6 = sshll.u32 %s1349_s9, 4  ;;  %s1248_s6 = int_to_ptr.vmem [resolvable:$false] %s1247_s6 }
 0x261   : > { %p1245_p7 = pnand %p1244_p5, %p1542_p10  ;;  %s1249_s17 = scalar_lea.vmem %s1248_s6, 256 }
 0x262   : > { %p1250_p0 = scmp.lt.s32.totalorder %s1647_s14, %s1248_s6  ;;  %p1251_p4 = scmp.lt.s32.totalorder %s1249_s17, %s1243_s7 }
 0x263   : > { %p1246_p9 = pneg %p1245_p7 }
 0x264   : > { %p1252_p2 = por %p1251_p4, %p1250_p0 }
 0x266   : > { %p1253_p8 = pnand %p1252_p2, %p1246_p9 }
 0x268   : > { %1256 = shalt.err (!%p1253_p8)
}
 0x269   : > { %s1257_s28 = scalar_lea.hbm %s1645_s10, 128  ;;  %s1261_s15 = scalar_lea.hbm %s1750_s20, 256 }
 0x26a   : > { %p1258_p12 = scmp.ne.s32.totalorder %s1645_s10, %s1257_s28  ;;  %p1262_p11 = scmp.lt.u32.totalorder %s1645_s10, %s1750_s20 }
 0x26b   : > { %p1263_p6 = scmp.lt.u32.totalorder %s1261_s15, %s1257_s28  ;;  %p1265_p5 = scmp.lt.u32.totalorder %s1257_s28, %s1645_s10 }
 0x26c   : > { %p1259_p1 = pnand %p1258_p12, %p1542_p10 }
 0x26d   : > { %p1264_p3 = por %p1263_p6, %p1262_p11 }
 0x26e   : > { %p1260_p13 = pneg %p1259_p1 }
 0x26f   : > { %p1266_p7 = por %p1265_p5, %p1264_p3 }
 0x271   : > { %p1267_p9 = pnand %p1266_p7, %p1260_p13 }
 0x273   : > { %1270 = shalt.err (!%p1267_p9)
}
 0x274   : > { %1013 = dma.vmem_to_hbm [thread:$0]  (%p1542_p10), %s1647_s14, 128, %s1645_s10, %s706_s29  }
 0x275 PF: > { %s1751_s8 = sld [smem:[#allocation20_spill]]  ;;  %s1752_s19 = sld [smem:[#allocation21_spill]] }
 0x276   : > { %p1754_p4 = scmp.ge.s32.totalorder %s1337_s26, 2 }
 0x27b   : > { %s744_s16 = sand.u32 1, %s1751_s8   ;;  %p1753_p0 = scmp.ne.s32.totalorder %s1752_s19, 0 }
 0x27c   : > { %s745_s24 = scalar_lea.sflag [#allocation6], %s744_s16 }
 0x27d   : > { %p1031_p2 = pnand %p1754_p4, %p1753_p0 }
 0x27f   : > { %1308 = dma.done.wait (!%p1031_p2), %s745_s24, 128  }
 0x280   : > { %1310 = vsyncadd (!%p1031_p2), %s745_s24, 4294967168  ;;  %s754_s7 = scalar_lea.sflag [#allocation14], %s744_s16 }
 0x281   : > { %1312 = dma.done.wait (!%p1031_p2), %s754_s7, 128  }
 0x282   : > { %1314 = vsyncadd (!%p1031_p2), %s754_s7, 4294967168  ;;  %s28_s26 = sadd.s32 1, %s1337_s26   ;;  %s1755_s12 = smov %s1762_s21 }
 0x283   : > { %p25_p8 = scmp.ge.s32.totalorder %s28_s26, 4   ;;  %s1756_s21 = smov %s1321_s22 }
 0x284   : > { %s1757_s22 = smov %s1325_s23  ;;  %s1758_s23 = smov %s1554_s27 }
 0x285   : > { %s1759_s24 = smov %s1333_s25  ;;  %s1760_s25 = smov %s1755_s12 }
 0x286   :  { %27 = sbr.rel (!%p25_p8) target bundleno = 12 (0xc), region = 126 }
 0x28d   :  { %759 = vsyncpa [#allocation5], 1 }
 0x28e   :  { %761 = vsyncpa [#allocation5 + $0x1], 1 }
 0x28f   :  { %762 = vsyncpa [#allocation8], 1 }
 0x290   :  { %763 = vsyncpa [#allocation11], 1 }
 0x291   :  { %764 = vsyncpa [#allocation6], 1 }
 0x292   :  { %766 = vsyncpa [#allocation6 + $0x1], 1 }
 0x293   :  { %767 = vsyncpa [#allocation14], 1 }
 0x294   :  { %769 = vsyncpa [#allocation14 + $0x1], 1 }

</bundles_post_ra>
